<compile_context>
chip_gen: v6e
topology: v6e:2x2x1
jax: 0.10.0
libtpu: 0.0.40
codegen_flags: <defaults>
</compile_context>

<pallas_src>
from functools import partial

import jax
import jax.numpy as jnp
from jax.experimental import pallas as pl
from jax.experimental.pallas import tpu as pltpu


def _gem_kernel(p_ref, x_ref, o_ref, acc_ref, *, eps, inv_hw, fast_pow):
    # p_ref:   (1,) f32 in SMEM (learnable exponent)
    # x_ref:   (tile_rows, tile_hw) input tile in VMEM
    # o_ref:   (tile_rows, 1) output tile in VMEM
    # acc_ref: (tile_rows, 1) f32 accumulator scratch (persists across k)
    k = pl.program_id(1)

    @pl.when(k == 0)
    def _():
        acc_ref[...] = jnp.zeros_like(acc_ref)

    p = p_ref[0]
    xc = jnp.maximum(x_ref[...].astype(jnp.float32), eps)      # clamp(min=eps) > 0
    if fast_pow:
        # bf16 log/exp halves the 2-transcendentals-per-element EUP cost
        # (v6e/v7x EUP is bf16-capable); accumulation stays in f32.
        xp = jnp.exp(p.astype(jnp.bfloat16)
                     * jnp.log(xc.astype(jnp.bfloat16))).astype(jnp.float32)
    else:
        xp = jnp.exp(p * jnp.log(xc))                            # xc ** p (dynamic exponent)
    acc_ref[...] += jnp.sum(xp, axis=-1, keepdims=True)

    @pl.when(k == pl.num_programs(1) - 1)
    def _():
        m = acc_ref[...] * inv_hw                                # mean over H*W
        o_ref[...] = jnp.exp(jnp.log(m) * (1.0 / p)).astype(o_ref.dtype)  # m ** (1/p)


def _round_up(a, b):
    return (a + b - 1) // b * b


def _choose_tiles(nc, hw, itemsize):
    """Pick (tile_rows, tile_hw) so a single input tile is <= ~4 MiB."""
    sub = {4: 8, 2: 16, 1: 32}.get(itemsize, 8)   # sublane packing multiple
    budget = 4 * 1024 * 1024                       # bytes per single-buffered input tile

    # Split the H*W reduction axis only when even a minimal row tile with the
    # full reduction axis would blow the budget.  tile_hw must be a multiple
    # of 128 *and* evenly divide hw (so no padded garbage enters the sum).
    tile_hw = hw
    if sub * hw * itemsize > budget:
        cand = min((hw // 128) * 128, (budget // (sub * itemsize)) // 128 * 128)
        while cand >= 128:
            if hw % cand == 0:
                tile_hw = cand
                break
            cand -= 128
        # else: fall back to full hw in one block.
        # TODO(synk): masked partial reduction tiles for huge hw not divisible by 128.

    max_rows = max(sub, (budget // (tile_hw * itemsize)) // sub * sub)
    if nc <= sub:
        tile_rows = nc                  # a full (small) leading dim is a legal block
    else:
        tile_rows = min(max_rows, _round_up(nc, sub))
    return tile_rows, tile_hw


def adaptive_gem(x, p, *, size=(1, 1), eps=1e-6, fast_pow=False):
    """GeM pooling. x: (N, C, H, W); p: shape-(1,) f32 learnable exponent."""
    # TODO(synk): only the default size=(1,1) (global GeM pooling) is implemented;
    # general adaptive output sizes need per-output-bin windowed reductions.
    assert tuple(size) == (1, 1), "only size=(1,1) implemented"
    N, C, H, W = x.shape
    x2d = x.reshape(N * C, H * W)        # keep caller dtype: no upcast into HBM
    NC, HW = x2d.shape

    tile_rows, tile_hw = _choose_tiles(NC, HW, x2d.dtype.itemsize)
    grid = (pl.cdiv(NC, tile_rows), pl.cdiv(HW, tile_hw))

    out = pl.pallas_call(
        partial(_gem_kernel, eps=float(eps), inv_hw=1.0 / HW, fast_pow=fast_pow),
        out_shape=jax.ShapeDtypeStruct((NC, 1), x.dtype),
        grid=grid,
        in_specs=[
            pl.BlockSpec(memory_space=pltpu.MemorySpace.SMEM),        # p (scalar param)
            pl.BlockSpec((tile_rows, tile_hw), lambda i, k: (i, k)),  # activations
        ],
        out_specs=pl.BlockSpec((tile_rows, 1), lambda i, k: (i, 0)),
        scratch_shapes=[pltpu.VMEM((tile_rows, 1), jnp.float32)],
        compiler_params=pltpu.CompilerParams(
            dimension_semantics=("parallel", "arbitrary")),
    )(p, x2d)

    return out.reshape(N, C, 1, 1)


def _reference(x, p, eps=1e-6):
    xf = x.astype(jnp.float32)
    xc = jnp.maximum(xf, eps)
    xp = xc ** p[0]
    m = jnp.mean(xp, axis=(2, 3), keepdims=True)
    return (m ** (1.0 / p[0])).astype(x.dtype)


if __name__ == "__main__":
    key = jax.random.PRNGKey(0)
    N, C, H, W = 2, 4, 16, 16
    x = jax.random.normal(key, (N, C, H, W), dtype=jnp.float32)

    # Deterministic parameter init, matching nn.Parameter(torch.ones(1) * 3).
    p = jnp.ones((1,), dtype=jnp.float32) * 3.0

    # Exact (f32 math) path.
    out = jax.block_until_ready(adaptive_gem(x, p, size=(1, 1), eps=1e-6))
    ref = _reference(x, p, eps=1e-6)
    assert out.shape == (N, C, 1, 1), out.shape
    assert jnp.allclose(out, ref, rtol=1e-4, atol=1e-5), (
        float(jnp.max(jnp.abs(out - ref))))

    # Fast EUP path (bf16 log/exp, f32 accumulation) -- looser tolerance.
    out_fast = jax.block_until_ready(adaptive_gem(x, p, eps=1e-6, fast_pow=True))
    assert jnp.allclose(out_fast, ref, rtol=1e-1, atol=1e-2), (
        float(jnp.max(jnp.abs(out_fast - ref))))

    # bf16 activations stay bf16 in HBM (halves input bytes on mem-bound gens).
    xb = x.astype(jnp.bfloat16)
    out_bf = jax.block_until_ready(adaptive_gem(xb, p, eps=1e-6))
    ref_bf = _reference(xb, p, eps=1e-6)
    assert out_bf.dtype == jnp.bfloat16
    assert jnp.allclose(out_bf.astype(jnp.float32), ref_bf.astype(jnp.float32),
                        rtol=5e-2, atol=1e-2)

    print("KERNEL_OK")
</pallas_src>

<mosaic_0001>
module attributes {stable_mosaic.version = 11 : i64} {
  func.func @_gem_kernel(%arg0: i32, %arg1: i32, %arg2: memref<1xf32, #tpu.memory_space<smem>>, %arg3: memref<8x256xf32, #tpu.memory_space<vmem>>, %arg4: memref<8x1xf32, #tpu.memory_space<vmem>>, %arg5: memref<8x1xf32, #tpu.memory_space<vmem>>) attributes {dimension_semantics = [#tpu.dimension_semantics<parallel>, #tpu.dimension_semantics<arbitrary>], iteration_bounds = array<i64: 1, 1>, scalar_prefetch = 0 : i64, scratch_operands = 1 : i64, tpu.core_type = #tpu.core_type<tc>, window_params = [{transform_indices = @transform_0, window_bounds = array<i64: 1>}, {transform_indices = @transform_1, window_bounds = array<i64: 8, 256>}, {transform_indices = @transform_2, window_bounds = array<i64: 8, 1>}]} {
    %c0_i32 = arith.constant 0 : i32
    %0 = arith.cmpi eq, %arg1, %c0_i32 : i32
    %1 = arith.extui %0 : i1 to i32
    %c0_i32_0 = arith.constant 0 : i32
    %2 = arith.cmpi ne, %1, %c0_i32_0 : i32
    scf.if %2 {
      %cst_10 = arith.constant 0.000000e+00 : f32
      %19 = vector.broadcast %cst_10 : f32 to vector<8x1xf32>
      %c0_11 = arith.constant 0 : index
      %c0_12 = arith.constant 0 : index
      %20 = vector.load %arg5[%c0_11, %c0_12] : memref<8x1xf32, #tpu.memory_space<vmem>>, vector<8x1xf32>
      tpu.vector_store %arg5[%c0_11, %c0_12], %19 {strides = array<i32>} : memref<8x1xf32, #tpu.memory_space<vmem>>, vector<8x1xf32>,
    } else {
    }
    %c0 = arith.constant 0 : index
    %3 = memref.load %arg2[%c0] : memref<1xf32, #tpu.memory_space<smem>>
    %c0_1 = arith.constant 0 : index
    %c0_2 = arith.constant 0 : index
    %4 = vector.load %arg3[%c0_1, %c0_2] : memref<8x256xf32, #tpu.memory_space<vmem>>, vector<8x256xf32>
    %cst = arith.constant 9.99999997E-7 : f32
    %5 = vector.broadcast %cst : f32 to vector<8x256xf32>
    %6 = arith.maximumf %4, %5 : vector<8x256xf32>
    %7 = math.log %6 : vector<8x256xf32>
    %8 = vector.broadcast %3 : f32 to vector<8x256xf32>
    %9 = arith.mulf %8, %7 : vector<8x256xf32>
    %10 = math.exp %9 : vector<8x256xf32>
    %c0_3 = arith.constant 0 : index
    %c0_4 = arith.constant 0 : index
    %11 = vector.load %arg5[%c0_3, %c0_4] : memref<8x1xf32, #tpu.memory_space<vmem>>, vector<8x1xf32>
    %cst_5 = arith.constant dense<0.000000e+00> : vector<8xf32>
    %12 = vector.multi_reduction <add>, %10, %cst_5 [1] : vector<8x256xf32> to vector<8xf32>
    %13 = vector.shape_cast %12 : vector<8xf32> to vector<8x1xf32>
    %14 = arith.addf %11, %13 : vector<8x1xf32>
    %c0_6 = arith.constant 0 : index
    %c0_7 = arith.constant 0 : index
    %15 = vector.load %arg5[%c0_6, %c0_7] : memref<8x1xf32, #tpu.memory_space<vmem>>, vector<8x1xf32>
    tpu.vector_store %arg5[%c0_6, %c0_7], %14 {strides = array<i32>} : memref<8x1xf32, #tpu.memory_space<vmem>>, vector<8x1xf32>,
    %c0_i32_8 = arith.constant 0 : i32
    %16 = arith.cmpi eq, %arg1, %c0_i32_8 : i32
    %17 = arith.extui %16 : i1 to i32
    %c0_i32_9 = arith.constant 0 : i32
    %18 = arith.cmpi ne, %17, %c0_i32_9 : i32
    scf.if %18 {
      %c0_10 = arith.constant 0 : index
      %c0_11 = arith.constant 0 : index
      %19 = vector.load %arg5[%c0_10, %c0_11] : memref<8x1xf32, #tpu.memory_space<vmem>>, vector<8x1xf32>
      %cst_12 = arith.constant 3.906250e-03 : f32
      %20 = vector.broadcast %cst_12 : f32 to vector<8x1xf32>
      %21 = arith.mulf %19, %20 : vector<8x1xf32>
      %22 = math.log %21 : vector<8x1xf32>
      %cst_13 = arith.constant 1.000000e+00 : f32
      %23 = arith.divf %cst_13, %3 : f32
      %24 = vector.broadcast %23 : f32 to vector<8x1xf32>
      %25 = arith.mulf %22, %24 : vector<8x1xf32>
      %26 = math.exp %25 : vector<8x1xf32>
      %c0_14 = arith.constant 0 : index
      %c0_15 = arith.constant 0 : index
      %27 = vector.load %arg4[%c0_14, %c0_15] : memref<8x1xf32, #tpu.memory_space<vmem>>, vector<8x1xf32>
      tpu.vector_store %arg4[%c0_14, %c0_15], %26 {strides = array<i32>} : memref<8x1xf32, #tpu.memory_space<vmem>>, vector<8x1xf32>,
    } else {
    }
    return
  }
  func.func @transform_0(%arg0: i32, %arg1: i32) -> i32 {
    %c0_i32 = arith.constant 0 : i32
    %c0_i32_0 = arith.constant 0 : i32
    return %c0_i32 : i32
  }
  func.func @transform_1(%arg0: i32, %arg1: i32) -> (i32, i32) {
    %c0_i32 = arith.constant 0 : i32
    return %arg0, %arg1 : i32, i32
  }
  func.func @transform_2(%arg0: i32, %arg1: i32) -> (i32, i32) {
    %c0_i32 = arith.constant 0 : i32
    %c0_i32_0 = arith.constant 0 : i32
    return %arg0, %c0_i32 : i32, i32
  }
}

</mosaic_0001>

<bundles_post_ra>
// kernel: tpu_custom_call.1
= control target key start
LH: loop header
LB: loop body
LE: loop exit
PB: predicated region body
PF: predicated region fallthrough
CT: control target
= control target key end

     0   :  { %8 = vsyncpa [#allocation5], 0  ;;  %s113_s9 = smov [#allocation4]   ;;  %s142_s0 = inlined_call_operand.<no memory space> [shape: f32[1], index: 0, kind: input, shape index: {}]   ;;  %s143_s1 = inlined_call_operand.hbm [shape: f32[8,256], index: 1, kind: input, shape index: {}]   ;;  %s144_s2 = inlined_call_operand.vmem [shape: f32[8,1], index: 2, kind: output, shape index: {}]  }
   0x1   :  { %s17_s10 = sshll.u32 %s113_s9, 4  ;;  %s18_s10 = int_to_ptr.vmem [resolvable:$true] %s17_s10 }
   0x2   :  { %s99_s11 = scalar_lea.vmem %s18_s10, 256  ;;  %p104_p1 = scmp.lt.s32.totalorder %s18_s10, %s18_s10 }
   0x3   :  { %p100_p0 = scmp.ne.s32.totalorder %s18_s10, %s99_s11  ;;  %p105_p2 = scmp.lt.s32.totalorder %s99_s11, %s99_s11 }
   0x5   :  { %p106_p3 = por %p105_p2, %p104_p1 }
   0x7   :  { %p107_p4 = pnand %p106_p3, %p100_p0 }
   0x9   :  { %110 = shalt.err (!%p107_p4)
}
   0xa   :  { %20 = dma.hbm_to_vmem [thread:$0]  %s143_s1, 256, %s18_s10, [#allocation5]  }
   0xb   :  { %111 = dma.done.wait [#allocation5], 256  }
   0xc   :  { %112 = vsyncadd [#allocation5], 4294967040  ;;  %vm28_vm0 = vcmask 7168   ;;  %v39_v0 = vstv %s142_s0  ;;  %v114_v1 = vmov 0.0   ;;  %v31_v2 = vld [vmem:[#allocation4] sm:$0xff]  ;;  %v32_v3 = vld [vmem:[#allocation4 + $0x8] sm:$0xff] }
   0xd   :  { %29 = vst.msk [vmem:[#allocation2] sm:$0xff] %vm28_vm0, %v114_v1  ;;  %77 = vrcp.f32 %v39_v0  ;;  %v33_v4 = vmax.f32 %v31_v2, 1e-06  ;;  %v34_v5 = vmax.f32 %v32_v3, 1e-06 }
   0xf   :  { %79 = vlog2.f32 %v33_v4 }
  0x10   :  { %81 = vlog2.f32 %v34_v5 }
  0x14   :  { %v46_v18 = vld [vmem:[#allocation2] sm:$0xff] }
  0x1a   :  { %v78_v6 = vpop.eup %77 }
  0x1b   :  { %73 = vpush %v78_v6 }
  0x1c   :  { %v80_v7 = vpop.eup %79 }
  0x1d   :  { %v82_v8 = vpop.eup %81  ;;  %v36_v9 = vmul.f32 0.6931472, %v80_v7 }
  0x1e   :  { %v38_v10 = vmul.f32 0.6931472, %v82_v8 }
  0x1f   :  { %v40_v11 = vmul.f32 %v39_v0, %v36_v9 }
  0x20   :  { %v41_v12 = vmul.f32 %v39_v0, %v38_v10 }
  0x21   :  { %v42_v13 = vmul.f32 1.442695, %v40_v11 }
  0x22   :  { %v44_v14 = vmul.f32 1.442695, %v41_v12 }
  0x23   :  { %83 = vpow2.f32 %v42_v13 }
  0x24   :  { %85 = vpow2.f32 %v44_v14 }
  0x30   :  { %v84_v15 = vpop.eup %83 }
  0x31   :  { %v86_v16 = vpop.eup %85 }
  0x32   :  { %v47_v17 = vadd.f32 %v86_v16, %v84_v15 }
  0x34   :  { %48 = vadd.xlane.f32.xlu0 %v47_v17 }
  0x4c   :  { %s74_s0 = spop %73 }
  0x4d   :  { %v63_v24 = vstv %s74_s0 }
  0xbd   :  { %v49_v19 = vpop.xlane.xlu0 %48 }
  0xbe   :  { %v50_v20 = vadd.f32 %v49_v19, %v46_v18 }
  0xc0   :  { %52 = vst.msk [vmem:[#allocation2] sm:$0xff] %vm28_vm0, %v50_v20 }
  0xc7   :  { %v56_v21 = vld [vmem:[#allocation2] sm:$0xff] }
  0xc8   :  { %v57_v22 = vmul.f32 0.00390625, %v56_v21 }
  0xca   :  { %87 = vlog2.f32 %v57_v22 }
  0xd7   :  { %v88_v23 = vpop.eup %87 }
  0xd8   :  { %v59_v25 = vmul.f32 0.6931472, %v88_v23 }
  0xda   :  { %v64_v26 = vmul.f32 %v63_v24, %v59_v25 }
  0xdc   :  { %v65_v27 = vmul.f32 1.442695, %v64_v26 }
  0xde   :  { %89 = vpow2.f32 %v65_v27 }
  0xeb   :  { %v90_v28 = vpop.eup %89 }
  0xec   :  { %67 = vst.msk [vmem:[%s144_s2] sm:$0xff] %vm28_vm0, %v90_v28 }
  0xed   :  { %72 = vsyncpa [#allocation5], 1 }

</bundles_post_ra>
